<compile_context>
chip_gen: v5e
topology: v5e:2x2
jax: 0.10.0
libtpu: 0.0.40
codegen_flags: <defaults>
</compile_context>

<pallas_src>
import functools

import jax
import jax.numpy as jnp
from jax.experimental import pallas as pl
from jax.experimental.pallas import tpu as pltpu


def _round_up(n, m):
    return ((n + m - 1) // m) * m


def encoder_kernel(x_ref, w1_ref, b1_ref, w2_ref, b2_ref, o_ref):
    # Layer 1: (TB, K) @ (K, H) on the MXU, f32 accumulate, bias add on VPU.
    t = (
        jnp.dot(x_ref[...], w1_ref[...], preferred_element_type=jnp.float32)
        + b1_ref[...]
    )
    # Layer 2: (TB, H) @ (H, H); intermediate `t` never leaves VMEM/vregs.
    y = (
        jnp.dot(t.astype(w2_ref.dtype), w2_ref[...],
                preferred_element_type=jnp.float32)
        + b2_ref[...]
    )
    o_ref[...] = y.astype(o_ref.dtype)


@functools.partial(jax.jit, static_argnames=("tb",))
def mock_encoder(x, w1, b1, w2, b2, *, tb=256):
    """Forward pass of MockEncoder.

    x : (B, input_size)
    w1: (input_size, hidden)   b1: (1, hidden)
    w2: (hidden, hidden)       b2: (1, hidden)
    Weights are stored (in, out) vs. PyTorch's (out, in), so
    y = (x @ w1 + b1) @ w2 + b2.
    """
    B, K = x.shape
    H = w1.shape[1]

    # Batch tile: 8-sublane aligned, capped at `tb` (256 default for the
    # 2x256^2 MXUs on v6e/v7x; also fine on v5e's 4x128^2).
    TB = min(_round_up(B, 8), tb)
    grid = (pl.cdiv(B, TB),)

    cost = pl.CostEstimate(
        flops=2 * B * K * H + 2 * B * H * H + 2 * B * H,
        transcendentals=0,
        bytes_accessed=4 * (B * K + K * H + H * H + 2 * H + B * H),
    )

    return pl.pallas_call(
        encoder_kernel,
        out_shape=jax.ShapeDtypeStruct((B, H), x.dtype),
        grid=grid,
        in_specs=[
            pl.BlockSpec((TB, K), lambda i: (i, 0)),   # x: tiled over batch
            pl.BlockSpec((K, H), lambda i: (0, 0)),    # w1: resident
            pl.BlockSpec((1, H), lambda i: (0, 0)),    # b1: resident
            pl.BlockSpec((H, H), lambda i: (0, 0)),    # w2: resident
            pl.BlockSpec((1, H), lambda i: (0, 0)),    # b2: resident
        ],
        out_specs=pl.BlockSpec((TB, H), lambda i: (i, 0)),
        compiler_params=pltpu.CompilerParams(
            dimension_semantics=("parallel",),
        ),
        cost_estimate=cost,
    )(x, w1, b1, w2, b2)


if __name__ == "__main__":
    input_size = 100
    hidden_size = 50
    batch = 2

    key = jax.random.PRNGKey(0)
    kx, k1, k2, k3, k4 = jax.random.split(key, 5)

    # Deterministic synthetic parameters (PyTorch-Linear-style uniform bounds).
    bound1 = 1.0 / (input_size ** 0.5)
    bound2 = 1.0 / (hidden_size ** 0.5)
    x = jax.random.normal(kx, (batch, input_size), dtype=jnp.float32)
    w1 = jax.random.uniform(k1, (input_size, hidden_size), jnp.float32, -bound1, bound1)
    b1 = jax.random.uniform(k2, (1, hidden_size), jnp.float32, -bound1, bound1)
    w2 = jax.random.uniform(k3, (hidden_size, hidden_size), jnp.float32, -bound2, bound2)
    b2 = jax.random.uniform(k4, (1, hidden_size), jnp.float32, -bound2, bound2)

    out = mock_encoder(x, w1, b1, w2, b2)
    jax.block_until_ready(out)

    # Pure-JAX reference: the original two-layer forward.
    ref = (x @ w1 + b1) @ w2 + b2
    assert out.shape == (batch, hidden_size)
    assert jnp.allclose(out, ref, atol=1e-4, rtol=1e-4), float(
        jnp.max(jnp.abs(out - ref))
    )

    print("KERNEL_OK")
</pallas_src>

<mosaic_0001>
module attributes {stable_mosaic.version = 11 : i64} {
  func.func @encoder_kernel(%arg0: i32, %arg1: memref<8x100xf32, #tpu.memory_space<vmem>>, %arg2: memref<100x50xf32, #tpu.memory_space<vmem>>, %arg3: memref<1x50xf32, #tpu.memory_space<vmem>>, %arg4: memref<50x50xf32, #tpu.memory_space<vmem>>, %arg5: memref<1x50xf32, #tpu.memory_space<vmem>>, %arg6: memref<8x50xf32, #tpu.memory_space<vmem>>) attributes {dimension_semantics = [#tpu.dimension_semantics<parallel>], iteration_bounds = array<i64: 1>, scalar_prefetch = 0 : i64, scratch_operands = 0 : i64, tpu.core_type = #tpu.core_type<tc>, window_params = [{transform_indices = @transform_0, window_bounds = array<i64: 8, 100>}, {pipeline_mode = #tpu.pipeline_mode<synchronous>, transform_indices = @transform_1, window_bounds = array<i64: 100, 50>}, {pipeline_mode = #tpu.pipeline_mode<synchronous>, transform_indices = @transform_2, window_bounds = array<i64: 1, 50>}, {pipeline_mode = #tpu.pipeline_mode<synchronous>, transform_indices = @transform_3, window_bounds = array<i64: 50, 50>}, {pipeline_mode = #tpu.pipeline_mode<synchronous>, transform_indices = @transform_4, window_bounds = array<i64: 1, 50>}, {transform_indices = @transform_5, window_bounds = array<i64: 8, 50>}]} {
    %c0 = arith.constant 0 : index
    %c0_0 = arith.constant 0 : index
    %0 = vector.load %arg1[%c0, %c0_0] : memref<8x100xf32, #tpu.memory_space<vmem>>, vector<8x100xf32>
    %c0_1 = arith.constant 0 : index
    %c0_2 = arith.constant 0 : index
    %1 = vector.load %arg2[%c0_1, %c0_2] : memref<100x50xf32, #tpu.memory_space<vmem>>, vector<100x50xf32>
    %cst = arith.constant dense<0.000000e+00> : vector<8x50xf32>
    %2 = tpu.matmul %0, %1, %cst {dimension_numbers = #tpu.dot_dimension_numbers<[1], [0], [0], [1], [0, 0, 1, 1], [], []>} : vector<8x100xf32>, vector<100x50xf32>, vector<8x50xf32> -> vector<8x50xf32>
    %c0_3 = arith.constant 0 : index
    %c0_4 = arith.constant 0 : index
    %3 = vector.load %arg3[%c0_3, %c0_4] : memref<1x50xf32, #tpu.memory_space<vmem>>, vector<1x50xf32>
    %4 = vector.broadcast %3 : vector<1x50xf32> to vector<8x50xf32>
    %5 = arith.addf %2, %4 : vector<8x50xf32>
    %c0_5 = arith.constant 0 : index
    %c0_6 = arith.constant 0 : index
    %6 = vector.load %arg4[%c0_5, %c0_6] : memref<50x50xf32, #tpu.memory_space<vmem>>, vector<50x50xf32>
    %cst_7 = arith.constant dense<0.000000e+00> : vector<8x50xf32>
    %7 = tpu.matmul %5, %6, %cst_7 {dimension_numbers = #tpu.dot_dimension_numbers<[1], [0], [0], [1], [0, 0, 1, 1], [], []>} : vector<8x50xf32>, vector<50x50xf32>, vector<8x50xf32> -> vector<8x50xf32>
    %c0_8 = arith.constant 0 : index
    %c0_9 = arith.constant 0 : index
    %8 = vector.load %arg5[%c0_8, %c0_9] : memref<1x50xf32, #tpu.memory_space<vmem>>, vector<1x50xf32>
    %9 = vector.broadcast %8 : vector<1x50xf32> to vector<8x50xf32>
    %10 = arith.addf %7, %9 : vector<8x50xf32>
    %c0_10 = arith.constant 0 : index
    %c0_11 = arith.constant 0 : index
    %11 = vector.load %arg6[%c0_10, %c0_11] : memref<8x50xf32, #tpu.memory_space<vmem>>, vector<8x50xf32>
    tpu.vector_store %arg6[%c0_10, %c0_11], %10 {strides = array<i32>} : memref<8x50xf32, #tpu.memory_space<vmem>>, vector<8x50xf32>,
    return
  }
  func.func @transform_0(%arg0: i32) -> (i32, i32) {
    %c0_i32 = arith.constant 0 : i32
    %c0_i32_0 = arith.constant 0 : i32
    return %arg0, %c0_i32 : i32, i32
  }
  func.func @transform_1(%arg0: i32) -> (i32, i32) {
    %c0_i32 = arith.constant 0 : i32
    %c0_i32_0 = arith.constant 0 : i32
    %c0_i32_1 = arith.constant 0 : i32
    return %c0_i32, %c0_i32_0 : i32, i32
  }
  func.func @transform_2(%arg0: i32) -> (i32, i32) {
    %c0_i32 = arith.constant 0 : i32
    %c0_i32_0 = arith.constant 0 : i32
    %c0_i32_1 = arith.constant 0 : i32
    return %c0_i32, %c0_i32_0 : i32, i32
  }
  func.func @transform_3(%arg0: i32) -> (i32, i32) {
    %c0_i32 = arith.constant 0 : i32
    %c0_i32_0 = arith.constant 0 : i32
    %c0_i32_1 = arith.constant 0 : i32
    return %c0_i32, %c0_i32_0 : i32, i32
  }
  func.func @transform_4(%arg0: i32) -> (i32, i32) {
    %c0_i32 = arith.constant 0 : i32
    %c0_i32_0 = arith.constant 0 : i32
    %c0_i32_1 = arith.constant 0 : i32
    return %c0_i32, %c0_i32_0 : i32, i32
  }
  func.func @transform_5(%arg0: i32) -> (i32, i32) {
    %c0_i32 = arith.constant 0 : i32
    %c0_i32_0 = arith.constant 0 : i32
    return %arg0, %c0_i32 : i32, i32
  }
}

</mosaic_0001>

<bundles_post_ra>
// kernel: mock_encoder.1
= control target key start
LH: loop header
LB: loop body
LE: loop exit
PB: predicated region body
PF: predicated region fallthrough
CT: control target
= control target key end

     0   :  { %10 = vsyncpa [#allocation3], 0  ;;  %vm43_vm0 = vcmask 1043456   ;;  %vm82_vm1 = vcmask 1041408   ;;  %vm39_vm2 = vcmask 818176   ;;  %vm78_vm3 = vcmask 408576   ;;  %s265_s0 = inlined_call_operand.vmem [shape: f32[2,100], index: 0, kind: input, shape index: {}]   ;;  %s266_s1 = inlined_call_operand.vmem [shape: f32[100,50], index: 1, kind: input, shape index: {}]   ;;  %s267_s2 = inlined_call_operand.vmem [shape: f32[1,50], index: 2, kind: input, shape index: {}]   ;;  %s268_s3 = inlined_call_operand.vmem [shape: f32[50,50], index: 3, kind: input, shape index: {}]   ;;  %s269_s4 = inlined_call_operand.vmem [shape: f32[1,50], index: 4, kind: input, shape index: {}]   ;;  %s270_s5 = inlined_call_operand.hbm [shape: f32[2,50], index: 5, kind: output, shape index: {}]  }
   0x1   :  { %v34_v0 = vld [vmem:[%s266_s1 + $0x60] sm:$0xf]  ;;  %v33_v1 = vld [vmem:[%s266_s1 + $0x58] sm:$0xff]  ;;  %v32_v2 = vld [vmem:[%s266_s1 + $0x50] sm:$0xff] }
   0x2   :  { %125 = vmatpush.msk.msra.mxu0 %vm43_vm0, %v34_v0  ;;  %v31_v3 = vld [vmem:[%s266_s1 + $0x48] sm:$0xff]  ;;  %v73_v4 = vld [vmem:[%s268_s3 + $0x30] sm:$0x3]  ;;  %v30_v6 = vld [vmem:[%s266_s1 + $0x40] sm:$0xff] }
   0x3   :  { %v72_v5 = vld [vmem:[%s268_s3 + $0x28] sm:$0xff]  ;;  %127 = vmatpush.msk.msra.mxu1 %vm82_vm1, %v73_v4  ;;  %v71_v7 = vld [vmem:[%s268_s3 + $0x20] sm:$0xff]  ;;  %v29_v8 = vld [vmem:[%s266_s1 + $0x38] sm:$0xff] }
   0x4   :  { %51 = vmatpush.msra.mxu0 %v33_v1  ;;  %v70_v9 = vld [vmem:[%s268_s3 + $0x18] sm:$0xff]  ;;  %v28_v10 = vld [vmem:[%s266_s1 + $0x30] sm:$0xff]  ;;  %v27_v12 = vld [vmem:[%s266_s1 + $0x28] sm:$0xff] }
   0x5   :  { %96 = vmatpush.msra.mxu1 %v72_v5  ;;  %v69_v11 = vld [vmem:[%s268_s3 + $0x10] sm:$0xff]  ;;  %v26_v13 = vld [vmem:[%s266_s1 + $0x20] sm:$0xff]  ;;  %v25_v14 = vld [vmem:[%s266_s1 + $0x18] sm:$0xff] }
   0x6   :  { %52 = vmatpush.msra.mxu0 %v32_v2  ;;  %v24_v15 = vld [vmem:[%s266_s1 + $0x10] sm:$0xff]  ;;  %v23_v16 = vld [vmem:[%s266_s1 + $0x8] sm:$0xff]  ;;  %v22_v17 = vld [vmem:[%s266_s1] sm:$0xff] }
   0x7   :  { %97 = vmatpush.msra.mxu1 %v71_v7  ;;  %v21_v18 = vld [vmem:[%s265_s0] sm:$0xff]  ;;  %v68_v19 = vld [vmem:[%s268_s3 + $0x8] sm:$0xff] }
   0x8   :  { %53 = vmatpush.msra.mxu0 %v31_v3  ;;  %v67_v20 = vld [vmem:[%s268_s3] sm:$0xff] }
   0x9   :  { %98 = vmatpush.msra.mxu1 %v70_v9  ;;  %v132_v21 = vld [vmem:[%s267_s2] ss:$0 sm:$0xff] }
   0xa   :  { %54 = vmatpush.msra.mxu0 %v30_v6  ;;  %v133_v24 = vld [vmem:[%s269_s4] ss:$0 sm:$0xff] }
   0xb   :  { %99 = vmatpush.msra.mxu1 %v69_v11 }
   0xc   :  { %55 = vmatpush.msra.mxu0 %v29_v8 }
   0xd   :  { %100 = vmatpush.msra.mxu1 %v68_v19 }
   0xe   :  { %56 = vmatpush.msra.mxu0 %v28_v10 }
   0xf   :  { %101 = vmatpush.msra.mxu1 %v67_v20 }
  0x10   :  { %57 = vmatpush.msra.mxu0 %v27_v12 }
  0x12   :  { %58 = vmatpush.msra.mxu0 %v26_v13 }
  0x14   :  { %59 = vmatpush.msra.mxu0 %v25_v14 }
  0x16   :  { %60 = vmatpush.msra.mxu0 %v24_v15 }
  0x18   :  { %61 = vmatpush.msra.mxu0 %v23_v16 }
  0x1a   :  { %62 = vmatpush.msra.mxu0 %v22_v17 }
  0x1b   :  { %126 = vmatmul.msk.f32.vlgmr.msra.gmra.mxu0 %vm39_vm2, %v21_v18 }
  0x98   :  { %v64_v22 = vpop.f32.mrf.mxu0 }
  0x99   :  { %v65_v23 = vadd.f32 %v132_v21, %v64_v22 }
  0x9b   :  { %128 = vmatmul.msk.f32.vlgmr.msra.gmra.mxu1 %vm78_vm3, %v65_v23 }
 0x118   :  { %v103_v25 = vpop.f32.mrf.mxu1 }
 0x119   :  { %v104_v26 = vadd.f32 %v133_v24, %v103_v25 }
 0x11b   :  { %106 = vst.msk [vmem:[#allocation2] sm:$0xff] %vm78_vm3, %v104_v26 }
 0x11c   :  { %110 = vsyncadd [#allocation3], 96  ;;  %s113_s3 = sshll.u32 %s270_s5, 4  ;;  %s160_s14 = smov [#allocation2]   ;;  %s114_s3 = int_to_ptr.hbm [resolvable:$true] %s113_s3 }
 0x11d   :  { %s111_s15 = sshll.u32 %s160_s14, 4  ;;  %s161_s2 = smov 32   ;;  %s112_s15 = int_to_ptr.vmem [resolvable:$true] %s111_s15 }
 0x11e   :  { %s162_s16 = smov 2  }
 0x11f   :  { %119 = dma.vmem_to_hbm [thread:$0]  %s112_s15, 32, %s114_s3, [#allocation3], %s161_s2, %s161_s2, %s162_s16  }
 0x120   :  { %158 = dma.done.wait [#allocation3], 128  }
 0x121   :  { %159 = vsyncadd [#allocation3], 4294967168 }
 0x122   :  { %124 = vsyncpa [#allocation3], 1 }

</bundles_post_ra>
